<compile_context>
chip_gen: v7x
topology: tpu7x:2x2x1
jax: 0.10.0
libtpu: 0.0.40
codegen_flags: <defaults>
</compile_context>

<pallas_src>
import jax
import jax.numpy as jnp
from jax.experimental import pallas as pl
from jax.experimental.pallas import tpu as pltpu

LANE = 128      # TPU lane width
SUBLANE = 8     # f32 sublane width


def _round_up(x, m):
    return ((x + m - 1) // m) * m


def baseline_kernel(x_ref, wp_ref, bp_ref, wf_ref, bf_ref, out_ref):
    """Fused GAP -> projection -> ReLU -> fc for one batch tile.

    x_ref  : (TB, C, HW) f32  input tile, spatial flattened
    wp_ref : (C, Dp)     f32  projection weight, 1/(H*W) pre-folded, D padded
    bp_ref : (1, Dp)     f32  projection bias (zero-padded)
    wf_ref : (Dp, Kp)    f32  fc weight (transposed from torch, zero-padded)
    bf_ref : (1, Kp)     f32  fc bias (zero-padded)
    out_ref: (TB, Kp)    f32  lane-dense logits (padded classes are zero)
    """
    x = x_ref[...]                                        # (TB, C, HW)
    # Global pooling: mean scale already folded into wp -> plain sum (XLU).
    pooled = jnp.sum(x, axis=-1)                          # (TB, C)
    # Feature projection (MXU) + bias + ReLU (VPU).
    feat = jnp.dot(pooled, wp_ref[...],
                   preferred_element_type=jnp.float32)    # (TB, Dp)
    feat = jnp.maximum(feat + bp_ref[...], 0.0)
    # Classifier (MXU) + bias; lane-dense store.
    logits = jnp.dot(feat, wf_ref[...],
                     preferred_element_type=jnp.float32)  # (TB, Kp)
    out_ref[...] = (logits + bf_ref[...]).astype(out_ref.dtype)


def prepare_params(wp, bp, wf_torch, bf, hw):
    """One-time host-side weight prep (outside the per-call path).

    wp:       (C, D)  projection weight
    bp:       (1, D)  projection bias
    wf_torch: (K, D)  torch nn.Linear weight layout
    bf:       (1, K)  fc bias
    hw:       H*W     number of pooled spatial positions
    Returns lane-padded, pre-scaled params (wp_p, bp_p, wf_p, bf_p).
    """
    C, D = wp.shape
    K = wf_torch.shape[0]
    Dp = _round_up(D, LANE)
    Kp = _round_up(K, LANE)

    wp_scaled = (wp / float(hw)).astype(jnp.float32)       # fold mean scale
    wp_p = jnp.zeros((C, Dp), jnp.float32).at[:, :D].set(wp_scaled)
    bp_p = jnp.zeros((1, Dp), jnp.float32).at[:, :D].set(bp.reshape(1, D))
    wf_t = wf_torch.T.astype(jnp.float32)                  # (D, K)
    wf_p = jnp.zeros((Dp, Kp), jnp.float32).at[:D, :K].set(wf_t)
    bf_p = jnp.zeros((1, Kp), jnp.float32).at[:, :K].set(bf.reshape(1, K))
    return wp_p, bp_p, wf_p, bf_p


def baseline_forward(x_nchw, wp_p, bp_p, wf_p, bf_p, num_classes, *, tb=128):
    """x_nchw: (B, C, H, W) f32. Returns logits (B, num_classes) f32."""
    B, C, H, W = x_nchw.shape
    HW = H * W
    Dp = wp_p.shape[1]
    Kp = wf_p.shape[1]

    # Batch tiling: sublane-aligned tile; pad batch to a tile multiple.
    if B <= tb:
        TB = _round_up(B, SUBLANE)
        B_pad = TB
    else:
        TB = tb
        B_pad = _round_up(B, TB)

    x3 = x_nchw.reshape(B, C, HW)                           # glue reshape
    if B_pad != B:
        x3 = jnp.pad(x3, ((0, B_pad - B), (0, 0), (0, 0)))

    grid = (B_pad // TB,)

    # VMEM budget: double-buffered x/out tiles + resident weights + headroom.
    tile_x_bytes = TB * C * HW * 4
    tile_o_bytes = TB * Kp * 4
    weight_bytes = (C * Dp + Dp + Dp * Kp + Kp) * 4
    vmem_bytes = 2 * (tile_x_bytes + tile_o_bytes + weight_bytes) + (4 << 20)
    vmem_bytes = min(max(vmem_bytes, 8 << 20), 48 << 20)   # safe on v5e..v7x

    cost = pl.CostEstimate(
        flops=2 * B_pad * (C * HW + C * Dp + Dp * Kp),
        transcendentals=0,
        bytes_accessed=B_pad * C * HW * 4 + weight_bytes + B_pad * Kp * 4,
    )

    out = pl.pallas_call(
        baseline_kernel,
        out_shape=jax.ShapeDtypeStruct((B_pad, Kp), jnp.float32),
        grid=grid,
        in_specs=[
            pl.BlockSpec((TB, C, HW), lambda i: (i, 0, 0)),  # x tile, pipelined
            pl.BlockSpec((C, Dp), lambda i: (0, 0)),         # wp, VMEM-resident
            pl.BlockSpec((1, Dp), lambda i: (0, 0)),         # bp
            pl.BlockSpec((Dp, Kp), lambda i: (0, 0)),        # wf
            pl.BlockSpec((1, Kp), lambda i: (0, 0)),         # bf
        ],
        out_specs=pl.BlockSpec((TB, Kp), lambda i: (i, 0)),  # lane-dense store
        compiler_params=pltpu.CompilerParams(
            dimension_semantics=("parallel",),
            vmem_limit_bytes=vmem_bytes,
        ),
        cost_estimate=cost,
    )(x3, wp_p, bp_p, wf_p, bf_p)

    return out[:B, :num_classes]


def _reference(x_nchw, wp, bp, wf_torch, bf):
    B, C, H, W = x_nchw.shape
    pooled = jnp.mean(x_nchw.reshape(B, C, H * W), axis=-1)
    feat = jnp.maximum(pooled @ wp + bp, 0.0)
    return feat @ wf_torch.T + bf


if __name__ == "__main__":
    # Small, module-consistent config.
    cfg = dict(num_classes=10, proj_out_dim=32)
    B, C, H, W = 2, 4, 16, 16
    D, K = cfg["proj_out_dim"], cfg["num_classes"]

    key = jax.random.PRNGKey(0)
    k_x, k_wp, k_bp, k_wf, k_bf, k_x2 = jax.random.split(key, 6)

    x = jax.random.normal(k_x, (B, C, H, W), dtype=jnp.float32)

    # Deterministic synthetic parameters (torch layouts).
    wp = jax.random.normal(k_wp, (C, D), dtype=jnp.float32) * 0.1    # proj weight
    bp = jax.random.normal(k_bp, (1, D), dtype=jnp.float32) * 0.1    # proj bias
    wf_torch = jax.random.normal(k_wf, (K, D), dtype=jnp.float32) * 0.1  # (K, D)
    bf = jax.random.normal(k_bf, (1, K), dtype=jnp.float32) * 0.1    # fc bias

    # One-time weight prep (transpose / pad / fold mean scale).
    wp_p, bp_p, wf_p, bf_p = prepare_params(wp, bp, wf_torch, bf, H * W)

    out = baseline_forward(x, wp_p, bp_p, wf_p, bf_p, K)
    jax.block_until_ready(out)
    ref = _reference(x, wp, bp, wf_torch, bf)
    assert out.shape == (B, K)
    assert jnp.allclose(out, ref, atol=1e-5, rtol=1e-5)

    # Secondary check: batch larger than one tile (exercises grid pipelining
    # and batch padding), still small.
    B2 = 300
    x2 = jax.random.normal(k_x2, (B2, C, H, W), dtype=jnp.float32)
    out2 = baseline_forward(x2, wp_p, bp_p, wf_p, bf_p, K)
    jax.block_until_ready(out2)
    ref2 = _reference(x2, wp, bp, wf_torch, bf)
    assert out2.shape == (B2, K)
    assert jnp.allclose(out2, ref2, atol=1e-4, rtol=1e-4)

    print("KERNEL_OK")
</pallas_src>

<mosaic_0001>
module attributes {stable_mosaic.version = 11 : i64} {
  func.func @baseline_kernel(%arg0: i32, %arg1: memref<8x4x256xf32, #tpu.memory_space<vmem>>, %arg2: memref<4x128xf32, #tpu.memory_space<vmem>>, %arg3: memref<1x128xf32, #tpu.memory_space<vmem>>, %arg4: memref<128x128xf32, #tpu.memory_space<vmem>>, %arg5: memref<1x128xf32, #tpu.memory_space<vmem>>, %arg6: memref<8x128xf32, #tpu.memory_space<vmem>>) attributes {dimension_semantics = [#tpu.dimension_semantics<parallel>], iteration_bounds = array<i64: 1>, scalar_prefetch = 0 : i64, scratch_operands = 0 : i64, tpu.core_type = #tpu.core_type<tc>, window_params = [{transform_indices = @transform_0, window_bounds = array<i64: 8, 4, 256>}, {pipeline_mode = #tpu.pipeline_mode<synchronous>, transform_indices = @transform_1, window_bounds = array<i64: 4, 128>}, {pipeline_mode = #tpu.pipeline_mode<synchronous>, transform_indices = @transform_2, window_bounds = array<i64: 1, 128>}, {pipeline_mode = #tpu.pipeline_mode<synchronous>, transform_indices = @transform_3, window_bounds = array<i64: 128, 128>}, {pipeline_mode = #tpu.pipeline_mode<synchronous>, transform_indices = @transform_4, window_bounds = array<i64: 1, 128>}, {transform_indices = @transform_5, window_bounds = array<i64: 8, 128>}]} {
    %c0 = arith.constant 0 : index
    %c0_0 = arith.constant 0 : index
    %c0_1 = arith.constant 0 : index
    %0 = vector.load %arg1[%c0, %c0_0, %c0_1] : memref<8x4x256xf32, #tpu.memory_space<vmem>>, vector<8x4x256xf32>
    %cst = arith.constant dense<0.000000e+00> : vector<8x4xf32>
    %1 = vector.multi_reduction <add>, %0, %cst [2] : vector<8x4x256xf32> to vector<8x4xf32>
    %c0_2 = arith.constant 0 : index
    %c0_3 = arith.constant 0 : index
    %2 = vector.load %arg2[%c0_2, %c0_3] : memref<4x128xf32, #tpu.memory_space<vmem>>, vector<4x128xf32>
    %cst_4 = arith.constant dense<0.000000e+00> : vector<8x128xf32>
    %3 = tpu.matmul %1, %2, %cst_4 {dimension_numbers = #tpu.dot_dimension_numbers<[1], [0], [0], [1], [0, 0, 1, 1], [], []>} : vector<8x4xf32>, vector<4x128xf32>, vector<8x128xf32> -> vector<8x128xf32>
    %c0_5 = arith.constant 0 : index
    %c0_6 = arith.constant 0 : index
    %4 = vector.load %arg3[%c0_5, %c0_6] : memref<1x128xf32, #tpu.memory_space<vmem>>, vector<1x128xf32>
    %5 = vector.broadcast %4 : vector<1x128xf32> to vector<8x128xf32>
    %6 = arith.addf %3, %5 : vector<8x128xf32>
    %cst_7 = arith.constant 0.000000e+00 : f32
    %7 = vector.broadcast %cst_7 : f32 to vector<8x128xf32>
    %8 = arith.maximumf %6, %7 : vector<8x128xf32>
    %c0_8 = arith.constant 0 : index
    %c0_9 = arith.constant 0 : index
    %9 = vector.load %arg4[%c0_8, %c0_9] : memref<128x128xf32, #tpu.memory_space<vmem>>, vector<128x128xf32>
    %cst_10 = arith.constant dense<0.000000e+00> : vector<8x128xf32>
    %10 = tpu.matmul %8, %9, %cst_10 {dimension_numbers = #tpu.dot_dimension_numbers<[1], [0], [0], [1], [0, 0, 1, 1], [], []>} : vector<8x128xf32>, vector<128x128xf32>, vector<8x128xf32> -> vector<8x128xf32>
    %c0_11 = arith.constant 0 : index
    %c0_12 = arith.constant 0 : index
    %11 = vector.load %arg5[%c0_11, %c0_12] : memref<1x128xf32, #tpu.memory_space<vmem>>, vector<1x128xf32>
    %12 = vector.broadcast %11 : vector<1x128xf32> to vector<8x128xf32>
    %13 = arith.addf %10, %12 : vector<8x128xf32>
    %c0_13 = arith.constant 0 : index
    %c0_14 = arith.constant 0 : index
    %14 = vector.load %arg6[%c0_13, %c0_14] : memref<8x128xf32, #tpu.memory_space<vmem>>, vector<8x128xf32>
    tpu.vector_store %arg6[%c0_13, %c0_14], %13 {strides = array<i32>} : memref<8x128xf32, #tpu.memory_space<vmem>>, vector<8x128xf32>,
    return
  }
  func.func @transform_0(%arg0: i32) -> (i32, i32, i32) {
    %c0_i32 = arith.constant 0 : i32
    %c0_i32_0 = arith.constant 0 : i32
    %c0_i32_1 = arith.constant 0 : i32
    return %arg0, %c0_i32, %c0_i32_0 : i32, i32, i32
  }
  func.func @transform_1(%arg0: i32) -> (i32, i32) {
    %c0_i32 = arith.constant 0 : i32
    %c0_i32_0 = arith.constant 0 : i32
    %c0_i32_1 = arith.constant 0 : i32
    return %c0_i32, %c0_i32_0 : i32, i32
  }
  func.func @transform_2(%arg0: i32) -> (i32, i32) {
    %c0_i32 = arith.constant 0 : i32
    %c0_i32_0 = arith.constant 0 : i32
    %c0_i32_1 = arith.constant 0 : i32
    return %c0_i32, %c0_i32_0 : i32, i32
  }
  func.func @transform_3(%arg0: i32) -> (i32, i32) {
    %c0_i32 = arith.constant 0 : i32
    %c0_i32_0 = arith.constant 0 : i32
    %c0_i32_1 = arith.constant 0 : i32
    return %c0_i32, %c0_i32_0 : i32, i32
  }
  func.func @transform_4(%arg0: i32) -> (i32, i32) {
    %c0_i32 = arith.constant 0 : i32
    %c0_i32_0 = arith.constant 0 : i32
    %c0_i32_1 = arith.constant 0 : i32
    return %c0_i32, %c0_i32_0 : i32, i32
  }
  func.func @transform_5(%arg0: i32) -> (i32, i32) {
    %c0_i32 = arith.constant 0 : i32
    %c0_i32_0 = arith.constant 0 : i32
    return %arg0, %c0_i32 : i32, i32
  }
}

</mosaic_0001>

<bundles_post_ra>
// kernel: tpu_custom_call.1
= control target key start
LH: loop header
LB: loop body
LE: loop exit
PB: predicated region body
PF: predicated region fallthrough
CT: control target
= control target key end

     0   :  { %10 = vsyncpa [#allocation3], 0  ;;  %s699_s0 = inlined_call_operand.hbm [shape: f32[8,4,256], index: 0, kind: input, shape index: {}]   ;;  %s700_s1 = inlined_call_operand.hbm [shape: f32[4,128], index: 1, kind: input, shape index: {}]   ;;  %s701_s2 = inlined_call_operand.vmem [shape: f32[1,128], index: 2, kind: input, shape index: {}]   ;;  %s702_s3 = inlined_call_operand.hbm [shape: f32[128,128], index: 3, kind: input, shape index: {}]   ;;  %s703_s4 = inlined_call_operand.vmem [shape: f32[1,128], index: 4, kind: input, shape index: {}]   ;;  %s704_s5 = inlined_call_operand.hbm [shape: f32[8,128], index: 5, kind: output, shape index: {}]  }
   0x1   :  { %11 = vsyncpa [#allocation6], 0 }
   0x2   :  { %12 = vsyncpa [#allocation4], 0  ;;  %s582_s18 = smov [#allocation5]   ;;  %s583_s20 = smov [#allocation2]  }
   0x3   :  { %s31_s19 = sshll.u32 %s582_s18, 4  ;;  %s18_s21 = sshll.u32 %s583_s20, 4  ;;  %s32_s19 = int_to_ptr.vmem [resolvable:$true] %s31_s19  ;;  %s621_s21 = int_to_ptr.vmem [resolvable:$true] %s18_s21 }
   0x4   :  { %s488_s24 = scalar_lea.hbm %s700_s1, 64 }
   0x5   :  { %p489_p0 = scmp.ne.s32.totalorder %s700_s1, %s488_s24  ;;  %p492_p1 = scmp.lt.u32.totalorder %s488_s24, %s700_s1 }
   0x7   :  { %p494_p2 = pnand %p492_p1, %p489_p0 }
   0x9   :  { %497 = shalt.err (!%p494_p2)
}
   0xa   :  { %s498_s29 = scalar_lea.vmem %s32_s19, 64  ;;  %p503_p4 = scmp.lt.s32.totalorder %s32_s19, %s32_s19 }
   0xb   :  { %p499_p3 = scmp.ne.s32.totalorder %s32_s19, %s498_s29  ;;  %p504_p5 = scmp.lt.s32.totalorder %s498_s29, %s498_s29 }
   0xd   :  { %p505_p6 = por %p504_p5, %p503_p4 }
   0xf   :  { %p506_p7 = pnand %p505_p6, %p499_p3 }
  0x11   :  { %509 = shalt.err (!%p506_p7)
}
  0x12   :  { %34 = dma.hbm_to_vmem [thread:$0]  %s700_s1, 64, %s32_s19, [#allocation6]  }
  0x13   :  { %s510_s9 = scalar_lea.hbm %s699_s0, 1024 }
  0x14   :  { %p511_p8 = scmp.ne.s32.totalorder %s699_s0, %s510_s9  ;;  %p514_p9 = scmp.lt.u32.totalorder %s510_s9, %s699_s0 }
  0x16   :  { %p516_p10 = pnand %p514_p9, %p511_p8 }
  0x18   :  { %519 = shalt.err (!%p516_p10)
}
  0x19   :  { %s520_s14 = scalar_lea.vmem %s621_s21, 1024  ;;  %p525_p12 = scmp.lt.s32.totalorder %s621_s21, %s621_s21 }
  0x1a   :  { %p521_p11 = scmp.ne.s32.totalorder %s621_s21, %s520_s14  ;;  %p526_p13 = scmp.lt.s32.totalorder %s520_s14, %s520_s14 }
  0x1c   :  { %p527_p0 = por %p526_p13, %p525_p12 }
  0x1e   :  { %p528_p1 = pnand %p527_p0, %p521_p11 }
  0x20   :  { %531 = shalt.err (!%p528_p1)
}
  0x21   :  { %s584_s1 = smov 128   ;;  %s585_s15 = smov 8  }
  0x22   :  { %24 = dma.hbm_to_vmem [thread:$0]  %s699_s0, 1024, %s621_s21, [#allocation3], %s584_s1, %s584_s1, %s585_s15  }
  0x23   :  { %s586_s18 = smov [#allocation7]   ;;  %s532_s23 = scalar_lea.hbm %s702_s3, 2048 }
  0x24   :  { %s42_s19 = sshll.u32 %s586_s18, 4  ;;  %p533_p2 = scmp.ne.s32.totalorder %s702_s3, %s532_s23  ;;  %s43_s19 = int_to_ptr.vmem [resolvable:$true] %s42_s19 }
  0x25   :  { %p536_p3 = scmp.lt.u32.totalorder %s532_s23, %s702_s3 }
  0x27   :  { %p538_p4 = pnand %p536_p3, %p533_p2 }
  0x29   :  { %541 = shalt.err (!%p538_p4)
}
  0x2a   :  { %s542_s28 = scalar_lea.vmem %s43_s19, 2048  ;;  %p547_p6 = scmp.lt.s32.totalorder %s43_s19, %s43_s19 }
  0x2b   :  { %p543_p5 = scmp.ne.s32.totalorder %s43_s19, %s542_s28  ;;  %p548_p7 = scmp.lt.s32.totalorder %s542_s28, %s542_s28 }
  0x2d   :  { %p549_p8 = por %p548_p7, %p547_p6 }
  0x2f   :  { %p550_p9 = pnand %p549_p8, %p543_p5 }
  0x31   :  { %553 = shalt.err (!%p550_p9)
}
  0x32   :  { %48 = dma.hbm_to_vmem [thread:$0]  %s702_s3, 2048, %s43_s19, [#allocation6], %s584_s1, %s584_s1, %s585_s15  }
  0x33   :  { %576 = dma.done.wait [#allocation3], 1024  }
  0x34   :  { %577 = vsyncadd [#allocation3], 4294966272 }
  0x35   :  { %578 = dma.done.wait [#allocation6], 2112  }
  0x36   :  { %579 = vsyncadd [#allocation6], 4294965184  ;;  %vm92_vm0 = vcmask 1043456   ;;  %v60_v0 = vld [vmem:[#allocation2] sm:$0xff]  ;;  %v62_v1 = vld [vmem:[#allocation2 + $0x10] sm:$0xff]  ;;  %v587_v40 = vmov 0.0  }
  0x37   :  { %v61_v2 = vld [vmem:[#allocation2 + $0x8] sm:$0xff]  ;;  %v76_v3 = vcombine.high %v60_v0, %v60_v0  ;;  %v93_v4 = vsel %vm92_vm0, %v60_v0, 0.0  ;;  %v78_v5 = vcombine.high %v62_v1, %v62_v1  ;;  %v103_v6 = vsel %vm92_vm0, %v62_v1, 0.0  ;;  %v63_v7 = vld [vmem:[#allocation2 + $0x18] sm:$0xff]  ;;  %v64_v8 = vld [vmem:[#allocation2 + $0x20] sm:$0xff]  ;;  %407 = vmatprep.subr.mxu0 %v587_v40  ;;  %s590_s7 = smov [#allocation8]  }
  0x38   :  { %v77_v9 = vcombine.high %v61_v2, %v61_v2  ;;  %v98_v10 = vsel %vm92_vm0, %v61_v2, 0.0  ;;  %v79_v11 = vcombine.high %v63_v7, %v63_v7  ;;  %v65_v12 = vld [vmem:[#allocation2 + $0x28] sm:$0xff]  ;;  %v108_v15 = vsel %vm92_vm0, %v63_v7, 0.0  ;;  %v66_v21 = vld [vmem:[#allocation2 + $0x30] sm:$0xff]  ;;  %v67_v22 = vld [vmem:[#allocation2 + $0x38] sm:$0xff]  ;;  %s374_s8 = sshll.u32 %s590_s7, 4  ;;  %s375_s8 = int_to_ptr.vmem [resolvable:$true] %s374_s8 }
  0x39   :  { %v94_v13 = vsel %vm92_vm0, %v76_v3, 0.0  ;;  %v104_v14 = vsel %vm92_vm0, %v78_v5, 0.0  ;;  %v80_v16 = vcombine.high %v64_v8, %v64_v8  ;;  %v81_v23 = vcombine.high %v65_v12, %v65_v12  ;;  %v133_v41 = vld [vmem:[#allocation5] sm:$0xf]  ;;  %v274_v42 = vld [vmem:[#allocation7] sm:$0xff]  ;;  %v275_v43 = vld [vmem:[#allocation7 + $0x8] sm:$0xff]  ;;  %p559_p11 = scmp.lt.s32.totalorder %s375_s8, %s375_s8 }
  0x3a   :  { %v95_v17 = vadd.f32 %v94_v13, %v93_v4  ;;  %v105_v18 = vadd.f32 %v104_v14, %v103_v6  ;;  %v99_v19 = vsel %vm92_vm0, %v77_v9, 0.0  ;;  %v109_v20 = vsel %vm92_vm0, %v79_v11, 0.0  ;;  %408 = vmatpush3.msk.msra.mxu0 %vm92_vm0, %v133_v41  ;;  %v276_v44 = vld [vmem:[#allocation7 + $0x10] sm:$0xff]  ;;  %v277_v47 = vld [vmem:[#allocation7 + $0x18] sm:$0xff]  ;;  %v278_v49 = vld [vmem:[#allocation7 + $0x20] sm:$0xff]  ;;  %s554_s9 = scalar_lea.vmem %s375_s8, 128 }
  0x3b   :  { %v100_v24 = vadd.f32 %v99_v19, %v98_v10  ;;  %v110_v25 = vadd.f32 %v109_v20, %v108_v15  ;;  %v113_v26 = vsel %vm92_vm0, %v64_v8, 0.0  ;;  %v114_v27 = vsel %vm92_vm0, %v80_v16, 0.0  ;;  %v279_v50 = vld [vmem:[#allocation7 + $0x28] sm:$0xff]  ;;  %v280_v52 = vld [vmem:[#allocation7 + $0x30] sm:$0xff]  ;;  %v281_v53 = vld [vmem:[#allocation7 + $0x38] sm:$0xff]  ;;  %p555_p10 = scmp.ne.s32.totalorder %s375_s8, %s554_s9  ;;  %p560_p12 = scmp.lt.s32.totalorder %s554_s9, %s554_s9 }
  0x3c   :  { %96 = vadd.xlane.f32.xlu0 %v95_v17  ;;  %106 = vadd.xlane.f32.xlu1 %v105_v18  ;;  %v118_v28 = vsel %vm92_vm0, %v65_v12, 0.0  ;;  %v119_v29 = vsel %vm92_vm0, %v81_v23, 0.0  ;;  %v82_v30 = vcombine.high %v66_v21, %v66_v21  ;;  %v83_v31 = vcombine.high %v67_v22, %v67_v22  ;;  %v282_v55 = vld [vmem:[#allocation7 + $0x40] sm:$0xff]  ;;  %v283_v56 = vld [vmem:[#allocation7 + $0x48] sm:$0xff]  ;;  %v284_v58 = vld [vmem:[#allocation7 + $0x50] sm:$0xff] }
  0x3d   :  { %v115_v32 = vadd.f32 %v114_v27, %v113_v26  ;;  %v120_v33 = vadd.f32 %v119_v29, %v118_v28  ;;  %v123_v34 = vsel %vm92_vm0, %v66_v21, 0.0  ;;  %v128_v36 = vsel %vm92_vm0, %v67_v22, 0.0  ;;  %v285_v59 = vld [vmem:[#allocation7 + $0x58] sm:$0xff]  ;;  %v286_v61 = vld [vmem:[#allocation7 + $0x60] sm:$0xff]  ;;  %v287_v62 = vld [vmem:[#allocation7 + $0x68] sm:$0xff]  ;;  %p561_p13 = por %p560_p12, %p559_p11 }
  0x3e   :  { %v124_v35 = vsel %vm92_vm0, %v82_v30, 0.0  ;;  %v129_v37 = vsel %vm92_vm0, %v83_v31, 0.0  ;;  %vm588_vm1 = vmmov 0   ;;  %v589_v45 = vmov 0.0|0.0   ;;  %v288_v27 = vld [vmem:[#allocation7 + $0x70] sm:$0xff]  ;;  %v289_v28 = vld [vmem:[#allocation7 + $0x78] sm:$0xff] }
  0x3f   :  { %v125_v38 = vadd.f32 %v124_v35, %v123_v34  ;;  %v130_v39 = vadd.f32 %v129_v37, %v128_v36  ;;  %409 = vmatprep.mubr.msk.f32.mxu0 %vm588_vm1, %v587_v40  ;;  %444 = vmatprep.mubr.msk.f32.mxu1 %vm588_vm1, %v587_v40  ;;  %v448_v46 = vpack.c.bf16 %v275_v43, %v274_v42  ;;  %v149_v0 = vlaneseq  ;;  %v384_v30 = vld [vmem:[%s701_s2] ss:$0 sm:$0xff]  ;;  %p562_p0 = pnand %p561_p13, %p555_p10 }
  0x40   :  { %101 = vadd.xlane.f32.xlu0 %v100_v24  ;;  %111 = vadd.xlane.f32.xlu1 %v110_v25  ;;  %v451_v48 = vpack.c.bf16 %v277_v47, %v276_v44  ;;  %v454_v51 = vpack.c.bf16 %v279_v50, %v278_v49  ;;  %v457_v54 = vpack.c.bf16 %v281_v53, %v280_v52  ;;  %vm183_vm2 = vcmask 1041409   ;;  %v387_v35 = vld [vmem:[%s703_s4] ss:$0 sm:$0xff] }
  0x41   :  { %447 = vmatprep.subr.bf16.mxu1 %v589_v45  ;;  %v460_v57 = vpack.c.bf16 %v283_v56, %v282_v55  ;;  %v463_v60 = vpack.c.bf16 %v285_v59, %v284_v58  ;;  %v466_v63 = vpack.c.bf16 %v287_v62, %v286_v61  ;;  %v150_v1 = vand.u32 127, %v149_v0 }
  0x42   :  { %449 = vmatpush3.bf16.msra.mxu1 %v448_v46  ;;  %v152_v2 = vshrl.u32 %v149_v0, 7  ;;  %vm185_vm3 = vcmask 1042434   ;;  %vm187_vm4 = vcmask 1043459   ;;  %vm189_vm5 = vcmask 1044484  }
  0x43   :  { %450 = vmatprep.subr.bf16.mxu1 %v589_v45  ;;  %vm191_vm6 = vcmask 1045509   ;;  %vm193_vm7 = vcmask 1046534   ;;  %vm195_vm8 = vcmask 1047559   ;;  %vm197_vm9 = vcmask 31744  }
  0x44   :  { %116 = vadd.xlane.f32.xlu0 %v115_v32  ;;  %121 = vadd.xlane.f32.xlu1 %v120_v33  ;;  %v153_v5 = vsub.s32 %v150_v1, %v152_v2  ;;  %v469_v29 = vpack.c.bf16 %v289_v28, %v288_v27 }
  0x46   :  { %452 = vmatpush3.bf16.msra.mxu1 %v451_v48 }
  0x47   :  { %453 = vmatprep.subr.bf16.mxu1 %v589_v45 }
  0x48   :  { %126 = vadd.xlane.f32.xlu0 %v125_v38  ;;  %131 = vadd.xlane.f32.xlu1 %v130_v39 }
  0x4a   :  { %455 = vmatpush3.bf16.msra.mxu1 %v454_v51 }
  0x4b   :  { %456 = vmatprep.subr.bf16.mxu1 %v589_v45 }
  0x4e   :  { %458 = vmatpush3.bf16.msra.mxu1 %v457_v54 }
  0x4f   :  { %459 = vmatprep.subr.bf16.mxu1 %v589_v45 }
  0x52   :  { %461 = vmatpush3.bf16.msra.mxu1 %v460_v57 }
  0x53   :  { %462 = vmatprep.subr.bf16.mxu1 %v589_v45 }
  0x56   :  { %464 = vmatpush3.bf16.msra.mxu1 %v463_v60 }
  0x57   :  { %465 = vmatprep.subr.bf16.mxu1 %v589_v45 }
  0x5a   :  { %467 = vmatpush3.bf16.msra.mxu1 %v466_v63 }
  0x5b   :  { %468 = vmatprep.subr.bf16.mxu1 %v589_v45 }
  0x5e   :  { %470 = vmatpush3.bf16.msra.mxu1 %v469_v29 }
  0xc9   :  { %v97_v3 = vpop.xlane.xlu0 %96  ;;  %v107_v4 = vpop.xlane.xlu1 %106 }
  0xca   :  { %v154_v8 = vrot.slane %v97_v3, %v153_v5  ;;  %v162_v11 = vrot.slane %v107_v4, %v153_v5 }
  0xcd   :  { %v102_v6 = vpop.xlane.xlu0 %101  ;;  %v112_v7 = vpop.xlane.xlu1 %111 }
  0xce   :  { %v158_v9 = vrot.slane %v102_v6, %v153_v5  ;;  %v166_v10 = vrot.slane %v112_v7, %v153_v5 }
  0xd0   :  { %v184_v12 = vsel %vm183_vm2, %v158_v9, %v154_v8 }
  0xd1   :  { %v186_v13 = vsel %vm185_vm3, %v162_v11, %v184_v12  ;;  %v117_v14 = vpop.xlane.xlu0 %116  ;;  %v122_v15 = vpop.xlane.xlu1 %121 }
  0xd2   :  { %v188_v16 = vsel %vm187_vm4, %v166_v10, %v186_v13  ;;  %v170_v17 = vrot.slane %v117_v14, %v153_v5  ;;  %v174_v18 = vrot.slane %v122_v15, %v153_v5 }
  0xd4   :  { %v190_v19 = vsel %vm189_vm5, %v170_v17, %v188_v16 }
  0xd5   :  { %v127_v20 = vpop.xlane.xlu0 %126  ;;  %v132_v21 = vpop.xlane.xlu1 %131  ;;  %v192_v24 = vsel %vm191_vm6, %v174_v18, %v190_v19 }
  0xd6   :  { %v178_v22 = vrot.slane %v127_v20, %v153_v5  ;;  %v182_v23 = vrot.slane %v132_v21, %v153_v5 }
  0xd8   :  { %v194_v25 = vsel %vm193_vm7, %v178_v22, %v192_v24 }
  0xd9   :  { %v196_v26 = vsel %vm195_vm8, %v182_v23, %v194_v25 }
  0xda   :  { %410 = vmatmul.mubr.msk.f32.vlgmr.msra.gmra.mrb[0].mxu0 %vm197_vm9, %v196_v26 }
 0x1ad   :  { %v269_v31 = vpop.f32.mrb[0].mxu0 }
 0x1ae   :  { %v270_v32 = vadd.f32 %v384_v30, %v269_v31  ;;  %v411_v33 = vpop.f32.mrb[1].mxu0 }
 0x1b0   :  { %v273_v34 = vmax.f32 %v270_v32, 0.0 }
 0x1b2   :  { %445 = vmatmul.mubr.f32.vlgmr.msra.gmra.mrb[0].mxu1 %v273_v34 }
 0x285   :  { %v363_v36 = vpop.f32.mrb[0].mxu1 }
 0x286   :  { %v364_v37 = vadd.f32 %v387_v35, %v363_v36  ;;  %v446_v38 = vpop.f32.mrb[1].mxu1 }
 0x288   :  { %367 = vst [vmem:[#allocation8] sm:$0xff] %v364_v37 }
 0x289   :  { %565 = shalt.err (!%p562_p0)
}
 0x28a   :  { %s566_s11 = scalar_lea.hbm %s704_s5, 128 }
 0x28b   :  { %p567_p1 = scmp.ne.s32.totalorder %s704_s5, %s566_s11  ;;  %p570_p2 = scmp.lt.u32.totalorder %s566_s11, %s704_s5 }
 0x28d   :  { %p572_p3 = pnand %p570_p2, %p567_p1 }
 0x28f   :  { %575 = shalt.err (!%p572_p3)
}
 0x290   :  { %377 = dma.vmem_to_hbm [thread:$0]  %s375_s8, 128, %s704_s5, [#allocation4]  }
 0x291   :  { %580 = dma.done.wait [#allocation4], 128  }
 0x292   :  { %581 = vsyncadd [#allocation4], 4294967168 }
 0x293   :  { %381 = vsyncpa [#allocation3], 1 }
 0x294   :  { %382 = vsyncpa [#allocation6], 1 }
 0x295   :  { %383 = vsyncpa [#allocation4], 1 }

</bundles_post_ra>
